<compile_context>
chip_gen: v6e
topology: v6e:2x2x1
jax: 0.10.0
libtpu: 0.0.40
codegen_flags: <defaults>
</compile_context>

<pallas_src>
import jax
import jax.numpy as jnp
from jax.experimental import pallas as pl
from jax.experimental.pallas import tpu as pltpu


def _ceil_div(a, b):
    return -(-a // b)


def _tpu_topology():
    """Return (tensorcores_per_chip, physical_vmem_bytes) with safe fallbacks."""
    try:
        kind = jax.devices()[0].device_kind.lower()
    except Exception:
        kind = ""
    is_v7 = ("v7" in kind) or ("7x" in kind)
    ncore = 2 if is_v7 else 1                  # v7x has 2 TCs/chip; v5e/v6e have 1
    vmem_cap = (64 << 20) if is_v7 else (128 << 20)
    try:
        vmem_cap = int(pltpu.get_tpu_info().vmem_capacity_bytes)
    except Exception:
        pass
    return ncore, vmem_cap


def _make_kl_kernel(true_rows, row_tile, n_tiles_per_core):
    def kernel(p_ref, q_ref, o_ref):
        c = pl.program_id(0)   # core-split index (size 1 on single-TC chips)
        i = pl.program_id(1)   # reduction step within this core

        # Zero this core's resident accumulator block on its first step.
        @pl.when(i == 0)
        def _():
            o_ref[...] = jnp.zeros_like(o_ref)

        P = p_ref[...].astype(jnp.float32)
        Q = q_ref[...].astype(jnp.float32)

        # Numerically-stable shifted logits (softmax over the lane axis).
        p_sh = P - jnp.max(P, axis=-1, keepdims=True)
        q_sh = Q - jnp.max(Q, axis=-1, keepdims=True)

        p_exp = jnp.exp(p_sh)
        p_den = jnp.sum(p_exp, axis=-1, keepdims=True)            # (rt, 1), >= 1
        q_den = jnp.sum(jnp.exp(q_sh), axis=-1, keepdims=True)    # (rt, 1), >= 1

        # Per-row KL using sum_j softmax(P)_j == 1:
        #   KL_r = (1/p_den) * sum_j p_exp_j*(p_sh_j - q_sh_j) - log(p_den / q_den)
        s = jnp.sum(p_exp * (p_sh - q_sh), axis=-1, keepdims=True)   # (rt, 1)
        kl_row = s * pl.reciprocal(p_den) - jnp.log(p_den / q_den)   # (rt, 1)

        # Mask rows past the true row count: the unspecified tail of the last
        # partial block and any fully-out-of-range (index-clamped) step of the
        # last core contribute exactly 0.  jnp.where also swallows any NaN/inf
        # produced from the unspecified padded rows.
        rt = kl_row.shape[0]
        row0 = (c * n_tiles_per_core + i) * row_tile
        rows = row0 + jax.lax.broadcasted_iota(jnp.int32, (rt, 1), 0)
        kl_row = jnp.where(rows < true_rows, kl_row, 0.0)

        # Fold rows into 8 sublane slots with pure VALU adds (no per-step XLU
        # reduce, no loop-carried scalar RMW); global sum happens in the wrapper.
        partial = kl_row.reshape(rt // 8, 8, 1).sum(axis=0)          # (8, 1)
        o_ref[...] += partial.reshape(1, 8, 1)

    return kernel


def kl_divergence(P, Q, *, row_tile=None):
    """sum(softmax(P,-1) * (log_softmax(P,-1) - log_softmax(Q,-1))) over the whole tensor.

    Inputs are consumed in their stored dtype (bf16 recommended: this kernel is
    HBM-bandwidth bound) and upcast to f32 inside the kernel.
    """
    assert P.shape == Q.shape, "P and Q must have the same shape"
    assert P.dtype == Q.dtype, "P and Q must have the same dtype"
    D = P.shape[-1]
    P2 = P.reshape(-1, D)
    Q2 = Q.reshape(-1, D)
    R = P2.shape[0]
    itemsize = jnp.dtype(P2.dtype).itemsize

    ncore, vmem_cap = _tpu_topology()

    # Generation-dependent block / VMEM budget: bigger blocks + higher limit on
    # 128-MiB-VMEM parts (v5e/v6e), conservative on 64-MiB v7x.
    if vmem_cap >= (96 << 20):
        target_block_bytes, vmem_cap_limit = 4 << 20, 96 << 20
    else:
        target_block_bytes, vmem_cap_limit = 2 << 20, 48 << 20

    # Sublane packing: 8 rows for 32-bit, 16 for bf16, 32 for 8-bit dtypes.
    align = max(8, 32 // max(itemsize, 1))

    # Large row tiles amortize the ~0.35 us per-grid-step overhead; cap so tiny
    # inputs don't over-tile.  Always a multiple of `align` (and of 8 for the
    # accumulator fold).
    if row_tile is None:
        row_tile = max(align,
                       (target_block_bytes // max(D * itemsize, 1)) // align * align)
    row_tile = _ceil_div(int(row_tile), align) * align
    row_tile = min(row_tile, _ceil_div(R, align) * align)
    row_tile = max(row_tile, align)

    n_tiles_total = _ceil_div(R, row_tile)          # real data blocks
    ncore = max(1, min(ncore, n_tiles_total))       # no empty cores
    n_tiles = _ceil_div(n_tiles_total, ncore)       # reduction steps per core

    # Data-block index for (core, step).  Steps past the last real block (only
    # possible on the multi-core split) are clamped onto the final valid block;
    # their rows are masked to 0 in-kernel, and the repeated block index lets
    # the pipeline skip the redundant DMA.
    if ncore * n_tiles > n_tiles_total:
        in_map = lambda c, i: (jnp.minimum(c * n_tiles + i, n_tiles_total - 1), 0)
    else:
        in_map = lambda c, i: (c * n_tiles + i, 0)

    # VMEM budget: 2 inputs x 2 pipeline buffers + f32 elementwise temporaries,
    # clamped to stay inside the chip's physical VMEM.
    block_in_bytes = row_tile * D * itemsize
    f32_tile_bytes = row_tile * D * 4
    vmem_limit = int(min(max(32 << 20,
                             4 * block_in_bytes + 8 * f32_tile_bytes + (2 << 20)),
                         vmem_cap_limit))

    # Leading axis shards the reduction across TensorCores only where that is
    # real hardware (v7x); plain "parallel" is documented as a near-no-op.
    core_sem = pltpu.CORE_PARALLEL if ncore > 1 else pltpu.ARBITRARY

    out = pl.pallas_call(
        _make_kl_kernel(R, row_tile, n_tiles),
        out_shape=jax.ShapeDtypeStruct((ncore, 8, 1), jnp.float32),
        grid_spec=pltpu.PrefetchScalarGridSpec(
            num_scalar_prefetch=0,
            grid=(ncore, n_tiles),
            in_specs=[
                pl.BlockSpec((row_tile, D), in_map),
                pl.BlockSpec((row_tile, D), in_map),
            ],
            out_specs=pl.BlockSpec((1, 8, 1), lambda c, i: (c, 0, 0)),
        ),
        compiler_params=pltpu.CompilerParams(
            dimension_semantics=(core_sem, pltpu.ARBITRARY),
            vmem_limit_bytes=vmem_limit,
        ),
    )(P2, Q2)
    # torch.mean of a 0-d tensor is the identity; return the scalar sum.
    return jnp.sum(out)


if __name__ == "__main__":
    keys = jax.random.split(jax.random.PRNGKey(0), 4)

    def ref_kl(P, Q):
        p = jax.nn.softmax(P, axis=-1)
        return jnp.sum(
            p * (jax.nn.log_softmax(P, axis=-1) - jax.nn.log_softmax(Q, axis=-1)))

    # 1) Aligned rows, f32: batch=2, seq=8, hidden=32 (softmax over last dim).
    P = jax.random.normal(keys[0], (2, 8, 32), dtype=jnp.float32)
    Q = jax.random.normal(keys[1], (2, 8, 32), dtype=jnp.float32)
    out = jax.block_until_ready(kl_divergence(P, Q))
    ref = ref_kl(P, Q)
    assert jnp.allclose(out, ref, rtol=1e-5, atol=1e-5), (out, ref)

    # 2) Ragged row count (21 rows) with a forced small tile: exercises the
    #    in-kernel tail masking that replaced the wrapper-side jnp.pad
    #    (multi-step accumulation plus one partial trailing block).
    P3 = jax.random.normal(keys[2], (3, 7, 32), dtype=jnp.float32)
    Q3 = jax.random.normal(keys[3], (3, 7, 32), dtype=jnp.float32)
    out3 = jax.block_until_ready(kl_divergence(P3, Q3, row_tile=8))
    ref3 = ref_kl(P3, Q3)
    assert jnp.allclose(out3, ref3, rtol=1e-5, atol=1e-5), (out3, ref3)

    # 3) bf16 storage path (recommended for this HBM-bound kernel); the kernel
    #    upcasts to f32 in-register, so it matches the f32 reference evaluated
    #    on the same bf16-quantized inputs.
    Pb, Qb = P.astype(jnp.bfloat16), Q.astype(jnp.bfloat16)
    outb = jax.block_until_ready(kl_divergence(Pb, Qb))
    refb = ref_kl(Pb.astype(jnp.float32), Qb.astype(jnp.float32))
    assert jnp.allclose(outb, refb, rtol=1e-4, atol=1e-4), (outb, refb)

    print("KERNEL_OK")
</pallas_src>

<mosaic_0001>
module attributes {stable_mosaic.version = 11 : i64} {
  func.func @kernel(%arg0: i32, %arg1: i32, %arg2: memref<16x32xf32, #tpu.memory_space<vmem>>, %arg3: memref<16x32xf32, #tpu.memory_space<vmem>>, %arg4: memref<1x8x1xf32, #tpu.memory_space<vmem>>) attributes {dimension_semantics = [#tpu.dimension_semantics<arbitrary>, #tpu.dimension_semantics<arbitrary>], iteration_bounds = array<i64: 1, 1>, scalar_prefetch = 0 : i64, scratch_operands = 0 : i64, tpu.core_type = #tpu.core_type<tc>, window_params = [{transform_indices = @transform_0, window_bounds = array<i64: 16, 32>}, {transform_indices = @transform_1, window_bounds = array<i64: 16, 32>}, {transform_indices = @transform_2, window_bounds = array<i64: 1, 8, 1>}]} {
    %c0_i32 = arith.constant 0 : i32
    %0 = arith.cmpi eq, %arg1, %c0_i32 : i32
    %1 = arith.extui %0 : i1 to i32
    %c0_i32_0 = arith.constant 0 : i32
    %2 = arith.cmpi ne, %1, %c0_i32_0 : i32
    scf.if %2 {
      %cst_17 = arith.constant 0.000000e+00 : f32
      %44 = vector.broadcast %cst_17 : f32 to vector<1x8x1xf32>
      %c0_18 = arith.constant 0 : index
      %c0_19 = arith.constant 0 : index
      %c0_20 = arith.constant 0 : index
      %45 = vector.load %arg4[%c0_18, %c0_19, %c0_20] : memref<1x8x1xf32, #tpu.memory_space<vmem>>, vector<1x8x1xf32>
      tpu.vector_store %arg4[%c0_18, %c0_19, %c0_20], %44 {strides = array<i32>} : memref<1x8x1xf32, #tpu.memory_space<vmem>>, vector<1x8x1xf32>,
    } else {
    }
    %c0 = arith.constant 0 : index
    %c0_1 = arith.constant 0 : index
    %3 = vector.load %arg2[%c0, %c0_1] : memref<16x32xf32, #tpu.memory_space<vmem>>, vector<16x32xf32>
    %c0_2 = arith.constant 0 : index
    %c0_3 = arith.constant 0 : index
    %4 = vector.load %arg3[%c0_2, %c0_3] : memref<16x32xf32, #tpu.memory_space<vmem>>, vector<16x32xf32>
    %cst = arith.constant dense<0xFF800000> : vector<16xf32>
    %5 = vector.multi_reduction <maximumf>, %3, %cst [1] : vector<16x32xf32> to vector<16xf32>
    %6 = vector.shape_cast %5 : vector<16xf32> to vector<16x1xf32>
    %7 = vector.broadcast %6 : vector<16x1xf32> to vector<16x32xf32>
    %8 = arith.subf %3, %7 : vector<16x32xf32>
    %cst_4 = arith.constant dense<0xFF800000> : vector<16xf32>
    %9 = vector.multi_reduction <maximumf>, %4, %cst_4 [1] : vector<16x32xf32> to vector<16xf32>
    %10 = vector.shape_cast %9 : vector<16xf32> to vector<16x1xf32>
    %11 = vector.broadcast %10 : vector<16x1xf32> to vector<16x32xf32>
    %12 = arith.subf %4, %11 : vector<16x32xf32>
    %13 = math.exp %8 : vector<16x32xf32>
    %cst_5 = arith.constant dense<0.000000e+00> : vector<16xf32>
    %14 = vector.multi_reduction <add>, %13, %cst_5 [1] : vector<16x32xf32> to vector<16xf32>
    %15 = vector.shape_cast %14 : vector<16xf32> to vector<16x1xf32>
    %16 = math.exp %12 : vector<16x32xf32>
    %cst_6 = arith.constant dense<0.000000e+00> : vector<16xf32>
    %17 = vector.multi_reduction <add>, %16, %cst_6 [1] : vector<16x32xf32> to vector<16xf32>
    %18 = vector.shape_cast %17 : vector<16xf32> to vector<16x1xf32>
    %19 = arith.subf %8, %12 : vector<16x32xf32>
    %20 = arith.mulf %13, %19 : vector<16x32xf32>
    %cst_7 = arith.constant dense<0.000000e+00> : vector<16xf32>
    %21 = vector.multi_reduction <add>, %20, %cst_7 [1] : vector<16x32xf32> to vector<16xf32>
    %22 = vector.shape_cast %21 : vector<16xf32> to vector<16x1xf32>
    %23 = tpu.reciprocal %15 : vector<16x1xf32> -> vector<16x1xf32>
    %24 = arith.mulf %22, %23 : vector<16x1xf32>
    %25 = arith.divf %15, %18 : vector<16x1xf32>
    %26 = math.log %25 : vector<16x1xf32>
    %27 = arith.subf %24, %26 : vector<16x1xf32>
    %c1_i32 = arith.constant 1 : i32
    %28 = arith.muli %arg0, %c1_i32 : i32
    %29 = arith.addi %28, %arg1 : i32
    %c16_i32 = arith.constant 16 : i32
    %30 = arith.muli %29, %c16_i32 : i32
    %31 = tpu.iota {dimensions = array<i32: 0>} : vector<16x1xi32>
    %32 = vector.broadcast %30 : i32 to vector<16x1xi32>
    %33 = arith.addi %32, %31 : vector<16x1xi32>
    %c16_i32_8 = arith.constant 16 : i32
    %34 = vector.broadcast %c16_i32_8 : i32 to vector<16x1xi32>
    %35 = arith.cmpi slt, %33, %34 : vector<16x1xi32>
    %cst_9 = arith.constant 0.000000e+00 : f32
    %36 = vector.broadcast %cst_9 : f32 to vector<16x1xf32>
    %37 = arith.select %35, %27, %36 : vector<16x1xi1>, vector<16x1xf32>
    %38 = vector.shape_cast %37 : vector<16x1xf32> to vector<2x8x1xf32>
    %cst_10 = arith.constant dense<0.000000e+00> : vector<8x1xf32>
    %39 = vector.multi_reduction <add>, %38, %cst_10 [0] : vector<2x8x1xf32> to vector<8x1xf32>
    %c0_11 = arith.constant 0 : index
    %c0_12 = arith.constant 0 : index
    %c0_13 = arith.constant 0 : index
    %40 = vector.load %arg4[%c0_11, %c0_12, %c0_13] : memref<1x8x1xf32, #tpu.memory_space<vmem>>, vector<1x8x1xf32>
    %41 = vector.shape_cast %39 : vector<8x1xf32> to vector<1x8x1xf32>
    %42 = arith.addf %40, %41 : vector<1x8x1xf32>
    %c0_14 = arith.constant 0 : index
    %c0_15 = arith.constant 0 : index
    %c0_16 = arith.constant 0 : index
    %43 = vector.load %arg4[%c0_14, %c0_15, %c0_16] : memref<1x8x1xf32, #tpu.memory_space<vmem>>, vector<1x8x1xf32>
    tpu.vector_store %arg4[%c0_14, %c0_15, %c0_16], %42 {strides = array<i32>} : memref<1x8x1xf32, #tpu.memory_space<vmem>>, vector<1x8x1xf32>,
    return
  }
  func.func @transform_0(%arg0: i32, %arg1: i32) -> (i32, i32) {
    %c1_i32 = arith.constant 1 : i32
    %0 = arith.muli %arg0, %c1_i32 : i32
    %1 = arith.addi %0, %arg1 : i32
    %c0_i32 = arith.constant 0 : i32
    %c0_i32_0 = arith.constant 0 : i32
    return %1, %c0_i32 : i32, i32
  }
  func.func @transform_1(%arg0: i32, %arg1: i32) -> (i32, i32) {
    %c1_i32 = arith.constant 1 : i32
    %0 = arith.muli %arg0, %c1_i32 : i32
    %1 = arith.addi %0, %arg1 : i32
    %c0_i32 = arith.constant 0 : i32
    %c0_i32_0 = arith.constant 0 : i32
    return %1, %c0_i32 : i32, i32
  }
  func.func @transform_2(%arg0: i32, %arg1: i32) -> (i32, i32, i32) {
    %c0_i32 = arith.constant 0 : i32
    %c0_i32_0 = arith.constant 0 : i32
    %c0_i32_1 = arith.constant 0 : i32
    return %arg0, %c0_i32, %c0_i32_0 : i32, i32, i32
  }
}

</mosaic_0001>

<bundles_post_ra>
// kernel: tpu_custom_call.1
= control target key start
LH: loop header
LB: loop body
LE: loop exit
PB: predicated region body
PF: predicated region fallthrough
CT: control target
= control target key end

     0   :  { %7 = vsyncpa [#allocation3], 0  ;;  %s261_s0 = inlined_call_operand.hbm [shape: f32[16,32], index: 0, kind: input, shape index: {}]   ;;  %s262_s1 = inlined_call_operand.hbm [shape: f32[16,32], index: 1, kind: input, shape index: {}]   ;;  %s263_s2 = inlined_call_operand.vmem [shape: f32[1,8,1], index: 2, kind: output, shape index: {}]  }
   0x1   :  { %8 = vsyncpa [#allocation5], 0  ;;  %s214_s9 = smov [#allocation2]  }
   0x2   :  { %s18_s10 = sshll.u32 %s214_s9, 4  ;;  %s19_s10 = int_to_ptr.vmem [resolvable:$true] %s18_s10 }
   0x3   :  { %s178_s11 = scalar_lea.vmem %s19_s10, 256  ;;  %p183_p1 = scmp.lt.s32.totalorder %s19_s10, %s19_s10 }
   0x4   :  { %p179_p0 = scmp.ne.s32.totalorder %s19_s10, %s178_s11  ;;  %p184_p2 = scmp.lt.s32.totalorder %s178_s11, %s178_s11 }
   0x6   :  { %p185_p3 = por %p184_p2, %p183_p1 }
   0x8   :  { %p186_p4 = pnand %p185_p3, %p179_p0 }
   0xa   :  { %189 = shalt.err (!%p186_p4)
}
   0xb   :  { %s215_s12 = smov 128   ;;  %s216_s13 = smov 8  }
   0xc   :  { %24 = dma.hbm_to_vmem [thread:$0]  %s261_s0, 256, %s19_s10, [#allocation3], %s215_s12, %s215_s12, %s216_s13  }
   0xd   :  { %s217_s16 = smov [#allocation4]  }
   0xe   :  { %s34_s17 = sshll.u32 %s217_s16, 4  ;;  %s35_s17 = int_to_ptr.vmem [resolvable:$true] %s34_s17 }
   0xf   :  { %s198_s18 = scalar_lea.vmem %s35_s17, 256  ;;  %p203_p6 = scmp.lt.s32.totalorder %s35_s17, %s35_s17 }
  0x10   :  { %p199_p5 = scmp.ne.s32.totalorder %s35_s17, %s198_s18  ;;  %p204_p7 = scmp.lt.s32.totalorder %s198_s18, %s198_s18 }
  0x12   :  { %p205_p8 = por %p204_p7, %p203_p6 }
  0x14   :  { %p206_p9 = pnand %p205_p8, %p199_p5 }
  0x16   :  { %209 = shalt.err (!%p206_p9)
}
  0x17   :  { %40 = dma.hbm_to_vmem [thread:$0]  %s262_s1, 256, %s35_s17, [#allocation5], %s215_s12, %s215_s12, %s216_s13  }
  0x18   :  { %210 = dma.done.wait [#allocation3], 256  }
  0x19   :  { %211 = vsyncadd [#allocation3], 4294967040 }
  0x1a   :  { %212 = dma.done.wait [#allocation5], 256  }
  0x1b   :  { %213 = vsyncadd [#allocation5], 4294967040  ;;  %vm55_vm0 = vcmask 7168   ;;  %v218_v0 = vmov 0.0   ;;  %vm61_vm1 = vcmask 261120   ;;  %v59_v1 = vld [vmem:[#allocation4] sm:$0xff] }
  0x1c   :  { %56 = vst.msk [vmem:[%s263_s2] sm:$0xff] %vm55_vm0, %v218_v0  ;;  %v57_v2 = vld [vmem:[#allocation2] sm:$0xff]  ;;  %v60_v3 = vld [vmem:[#allocation4 + $0x8] sm:$0xff]  ;;  %v70_v4 = vsel %vm61_vm1, %v59_v1, -inf  ;;  %v58_v6 = vld [vmem:[#allocation2 + $0x8] sm:$0xff] }
  0x1d   :  { %v62_v5 = vsel %vm61_vm1, %v57_v2, -inf  ;;  %71 = vmax.xlane.f32.xlu0 %v70_v4  ;;  %v73_v7 = vsel %vm61_vm1, %v60_v3, -inf  ;;  %v65_v8 = vsel %vm61_vm1, %v58_v6, -inf }
  0x1e   :  { %63 = vmax.xlane.f32.xlu1 %v62_v5 }
  0x21   :  { %74 = vmax.xlane.f32.xlu0 %v73_v7 }
  0x22   :  { %66 = vmax.xlane.f32.xlu1 %v65_v8 }
  0x23   :  { %v135_v55 = vld [vmem:[%s263_s2] sm:$0xff] }
  0xa6   :  { %v72_v9 = vpop.xlane.xlu0 %71 }
  0xa7   :  { %v64_v10 = vpop.xlane.xlu1 %63  ;;  %v76_v11 = vsub.f32 %v59_v1, %v72_v9 }
  0xa8   :  { %v68_v12 = vsub.f32 %v57_v2, %v64_v10 }
  0xa9   :  { %v88_v13 = vmul.f32 1.442695, %v76_v11 }
  0xaa   :  { %v78_v14 = vmul.f32 1.442695, %v68_v12  ;;  %v75_v15 = vpop.xlane.xlu0 %74  ;;  %v98_v24 = vsub.f32 %v68_v12, %v76_v11 }
  0xab   :  { %v67_v16 = vpop.xlane.xlu1 %66  ;;  %150 = vpow2.f32 %v88_v13  ;;  %v77_v17 = vsub.f32 %v60_v3, %v75_v15 }
  0xac   :  { %v69_v18 = vsub.f32 %v58_v6, %v67_v16  ;;  %152 = vpow2.f32 %v78_v14 }
  0xad   :  { %v90_v19 = vmul.f32 1.442695, %v77_v17 }
  0xae   :  { %v80_v20 = vmul.f32 1.442695, %v69_v18  ;;  %v99_v30 = vsub.f32 %v69_v18, %v77_v17 }
  0xaf   :  { %154 = vpow2.f32 %v90_v19 }
  0xb0   :  { %156 = vpow2.f32 %v80_v20 }
  0xb8   :  { %v151_v21 = vpop.eup %150 }
  0xb9   :  { %v92_v22 = vsel %vm61_vm1, %v151_v21, 0.0  ;;  %v153_v23 = vpop.eup %152 }
  0xba   :  { %93 = vadd.xlane.f32.xlu0 %v92_v22  ;;  %v82_v25 = vsel %vm61_vm1, %v153_v23, 0.0  ;;  %v100_v28 = vmul.f32 %v153_v23, %v98_v24 }
  0xbc   :  { %v155_v26 = vpop.eup %154  ;;  %v102_v32 = vsel %vm61_vm1, %v100_v28, 0.0 }
  0xbd   :  { %v95_v27 = vsel %vm61_vm1, %v155_v26, 0.0  ;;  %v157_v29 = vpop.eup %156 }
  0xbe   :  { %96 = vadd.xlane.f32.xlu1 %v95_v27  ;;  %83 = vadd.xlane.f32.xlu0 %v82_v25  ;;  %v85_v31 = vsel %vm61_vm1, %v157_v29, 0.0  ;;  %v101_v33 = vmul.f32 %v157_v29, %v99_v30 }
  0xc0   :  { %v105_v34 = vsel %vm61_vm1, %v101_v33, 0.0 }
  0xc2   :  { %103 = vadd.xlane.f32.xlu0 %v102_v32  ;;  %86 = vadd.xlane.f32.xlu1 %v85_v31 }
  0xc6   :  { %106 = vadd.xlane.f32.xlu1 %v105_v34 }
 0x143   :  { %v94_v35 = vpop.xlane.xlu0 %93 }
 0x144   :  { %158 = vrcp.f32 %v94_v35 }
 0x147   :  { %v97_v36 = vpop.xlane.xlu1 %96  ;;  %v84_v38 = vpop.xlane.xlu0 %83 }
 0x148   :  { %160 = vrcp.f32 %v97_v36 }
 0x14b   :  { %v87_v40 = vpop.xlane.xlu1 %86  ;;  %v104_v48 = vpop.xlane.xlu0 %103 }
 0x14f   :  { %v107_v49 = vpop.xlane.xlu1 %106 }
 0x151   :  { %v159_v37 = vpop.eup %158 }
 0x152   :  { %v113_v39 = vmul.f32 %v159_v37, %v84_v38 }
 0x154   :  { %162 = vlog2.f32 %v113_v39 }
 0x155   :  { %v161_v41 = vpop.eup %160  ;;  %164 = vrcp.f32 %v84_v38 }
 0x156   :  { %166 = vrcp.f32 %v87_v40  ;;  %v115_v42 = vmul.f32 %v161_v41, %v87_v40 }
 0x158   :  { %168 = vlog2.f32 %v115_v42 }
 0x161   :  { %v163_v43 = vpop.eup %162 }
 0x162   :  { %v165_v44 = vpop.eup %164  ;;  %v117_v46 = vmul.f32 0.6931472, %v163_v43 }
 0x163   :  { %v167_v45 = vpop.eup %166  ;;  %v110_v50 = vmul.f32 %v165_v44, %v104_v48 }
 0x164   :  { %v111_v52 = vmul.f32 %v167_v45, %v107_v49 }
 0x165   :  { %v169_v47 = vpop.eup %168  ;;  %v120_v53 = vsub.f32 %v110_v50, %v117_v46 }
 0x166   :  { %v119_v51 = vmul.f32 0.6931472, %v169_v47 }
 0x168   :  { %v121_v54 = vsub.f32 %v111_v52, %v119_v51 }
 0x16a   :  { %v134_v56 = vadd.f32 %v121_v54, %v120_v53 }
 0x16c   :  { %v136_v57 = vadd.f32 %v135_v55, %v134_v56 }
 0x16e   :  { %138 = vst.msk [vmem:[%s263_s2] sm:$0xff] %vm55_vm0, %v136_v57 }
 0x16f   :  { %143 = vsyncpa [#allocation3], 1 }
 0x170   :  { %144 = vsyncpa [#allocation5], 1 }

</bundles_post_ra>
